<compile_context>
chip_gen: v5e
topology: v5e:2x2
jax: 0.10.0
libtpu: 0.0.40
codegen_flags: <defaults>
</compile_context>

<pallas_src>
import jax
import jax.numpy as jnp
import numpy as np
from jax.experimental import pallas as pl
from jax.experimental.pallas import tpu as pltpu


def _round_up(v, m):
    return (v + m - 1) // m * m


def _vmem_budget_bytes():
    """75% of the per-core VMEM capacity (headroom for compiler scratch)."""
    cap = 64 * 1024 * 1024  # conservative fallback (v7x per-TC physical)
    try:
        info = pltpu.get_tpu_info()
        cap = int(getattr(info, "vmem_capacity_bytes", cap))
    except Exception:
        pass
    return int(cap) * 3 // 4


def _choose_tile_b(batch, tile_b_max):
    """Pick a sublane-aligned batch tile: prefer >=2 parallel tiles (megacore),
    then minimal padding waste, then the largest tile."""
    b_al = _round_up(max(batch, 1), 8)
    cap = min(tile_b_max, b_al)
    best = None
    for tb in range(cap, 7, -8):
        b_pad = _round_up(b_al, tb)
        n_tiles = b_pad // tb
        waste = b_pad - batch
        key = (0 if n_tiles >= 2 else 1, waste, -tb)
        if best is None or key < best[0]:
            best = (key, tb, b_pad)
    _, tb, b_pad = best
    return tb, b_pad


# ----------------------------------------------------------------------------
# Builder: static preprocessing (mask partition, weight packing, bf16 casts)
# done once; returns a jitted forward(z) -> (z_out, forwardLogjac).
# ----------------------------------------------------------------------------
def build_realnvp_forward(mask_list, layer_params, *, tile_b=512):
    mask_list = np.asarray(mask_list, dtype=bool)
    L, D = mask_list.shape
    assert L == len(layer_params)
    mask0 = mask_list[0]
    Dh = int(mask0.sum())
    assert 2 * Dh == D, "each mask must select exactly half the features"

    idx0 = np.nonzero(~mask0)[0]     # slot-0 half (mask0 == 0 columns)
    idx1 = np.nonzero(mask0)[0]      # slot-1 half (mask0 == 1 columns)

    # Static per-layer active-slot table (0 = idx0 half, 1 = idx1 half).
    # Even layers transform x (mask_i==0 half), odd layers transform y
    # (mask_i==1 half) -- exactly the PyTorch module's branches.
    active_slots = []
    for i in range(L):
        mi = mask_list[i]
        if np.array_equal(mi, mask0):
            x_slot, y_slot = 0, 1
        elif np.array_equal(mi, ~mask0):
            x_slot, y_slot = 1, 0
        else:
            raise ValueError("all masks must share the same feature partition")
        active_slots.append(x_slot if (i % 2 == 0) else y_slot)

    H = layer_params[0]["w1s"].shape[1]

    # ---- weight packing (done once, bf16 for the MXU) ----
    # First Linear layers of s and t share the passive input: concat to [Dh,2H].
    w1 = jnp.stack([jnp.concatenate([lp["w1s"], lp["w1t"]], axis=1)
                    for lp in layer_params]).astype(jnp.bfloat16)     # [L, Dh, 2H]

    # Second Linear: fuse block-diagonally ONLY when both fused dims fit one
    # MXU tile; otherwise keep dense per-net weights (half FLOPs / bytes).
    fuse_w2 = (2 * H <= 128) and (2 * Dh <= 128)
    if fuse_w2:
        zeros = jnp.zeros((H, Dh), jnp.float32)
        w2 = jnp.stack([jnp.concatenate(
            [jnp.concatenate([lp["w2s"], zeros], axis=1),
             jnp.concatenate([zeros, lp["w2t"]], axis=1)], axis=0)
            for lp in layer_params]).astype(jnp.bfloat16)             # [L, 2H, 2Dh]
    else:
        w2 = jnp.stack([jnp.stack([lp["w2s"], lp["w2t"]], axis=0)
                        for lp in layer_params]).astype(jnp.bfloat16)  # [L, 2, H, Dh]

    # All biases packed into ONE per-layer f32 block: [b1s | b1t | b2s | b2t].
    b_all = jnp.stack([jnp.concatenate(
        [lp["b1s"], lp["b1t"], lp["b2s"], lp["b2t"]], axis=1)
        for lp in layer_params]).astype(jnp.float32)                  # [L, 1, 2H+2Dh]

    # ---- VMEM budgeting ----
    budget = _vmem_budget_bytes()
    weight_bytes = (w1.size + w2.size) * 2 + b_all.size * 4           # bf16 / f32
    resident_bytes = 2 * weight_bytes                                 # allow 2 buffers
    assert resident_bytes <= budget // 2, (
        "stacked layer weights too large for the VMEM-resident strategy; "
        "need the streaming (grid=(batch_tiles, L)) fallback")

    # Per-row double-buffered bytes: state in + state out (f32, D lanes) + lj.
    per_row = 2 * (2 * D * 4 + 128 * 4)
    tile_b = max(8, int(tile_b) // 8 * 8)
    tile_cap = max(8, ((budget - resident_bytes - (8 << 20)) // per_row) // 8 * 8)
    tile_b = min(tile_b, tile_cap)

    # ------------------------------------------------------------------------
    # Fused kernel: all L coupling layers for one batch tile (static unroll).
    #   z_ref  : VMEM [tb, D]  f32   de-interleaved state ([:Dh]=slot0, [Dh:]=slot1)
    #   w1_ref : VMEM [L, Dh, 2H]        bf16 (resident, index_map -> 0)
    #   w2_ref : VMEM [L, 2H, 2Dh] or [L, 2, H, Dh]  bf16 (resident)
    #   b_ref  : VMEM [L, 1, 2H+2Dh]     f32  (resident)
    #   zo_ref : VMEM [tb, D]  f32   output state (aliased to z_ref's HBM buffer)
    #   lj_ref : VMEM [tb, 128] f32  lane-broadcast log-jacobian
    # ------------------------------------------------------------------------
    def kernel(z_ref, w1_ref, w2_ref, b_ref, zo_ref, lj_ref):
        z = z_ref[...]                               # [tb, D] f32
        h0 = z[:, :Dh]
        h1 = z[:, Dh:]
        lj = jnp.zeros((z.shape[0], Dh), jnp.float32)

        for l in range(L):                           # static unroll (small L)
            a_slot = active_slots[l]                 # Python int -> static slices
            p = h1 if a_slot == 0 else h0            # passive half (MLP input)
            a = h0 if a_slot == 0 else h1            # active half (transformed)

            w1l = w1_ref[l]                          # [Dh, 2H] bf16
            bl = b_ref[l]                            # [1, 2H+2Dh] f32
            b1 = bl[:, :2 * H]
            b2s = bl[:, 2 * H:2 * H + Dh]
            b2t = bl[:, 2 * H + Dh:]

            # Fused first Linear of s and t (one MXU push), f32 accumulate.
            h = jnp.maximum(
                jnp.dot(p.astype(jnp.bfloat16), w1l,
                        preferred_element_type=jnp.float32) + b1, 0.0)
            hb = h.astype(jnp.bfloat16)

            if fuse_w2:
                w2l = w2_ref[l]                      # [2H, 2Dh] block-diag bf16
                st = jnp.dot(hb, w2l, preferred_element_type=jnp.float32)
                s = st[:, :Dh] + b2s
                t = st[:, Dh:] + b2t
            else:
                w2l = w2_ref[l]                      # [2, H, Dh] bf16
                s = jnp.dot(hb[:, :H], w2l[0],
                            preferred_element_type=jnp.float32) + b2s
                t = jnp.dot(hb[:, H:], w2l[1],
                            preferred_element_type=jnp.float32) + b2t

            a_new = jnp.exp(s) * a + t               # f32 affine update
            lj = lj + s                              # f32 VPU accumulate [tb, Dh]
            if a_slot == 0:
                h0 = a_new
            else:
                h1 = a_new

        zo_ref[:, :Dh] = h0
        zo_ref[:, Dh:] = h1
        # single cross-lane reduce, lane-broadcast into the output block
        lj_ref[...] = jnp.zeros_like(lj_ref) + jnp.sum(lj, axis=1, keepdims=True)

    def forward(z):
        B = z.shape[0]
        assert z.shape[1] == D
        tb, b_pad = _choose_tile_b(B, tile_b)
        n_tiles = b_pad // tb

        # De-interleave ONCE (static column gather) into lane-contiguous halves.
        x0 = z[:, idx0].astype(jnp.float32)
        x1 = z[:, idx1].astype(jnp.float32)
        state_in = jnp.concatenate([x0, x1], axis=1)          # [B, D]
        if b_pad != B:
            state_in = jnp.pad(state_in, ((0, b_pad - B), (0, 0)))

        need = resident_bytes + 2 * (2 * tb * D * 4 + tb * 128 * 4) + (8 << 20)
        vmem_limit = int(min(budget, max(need, 32 << 20)))

        state_out, lj = pl.pallas_call(
            kernel,
            out_shape=(
                jax.ShapeDtypeStruct((b_pad, D), jnp.float32),
                jax.ShapeDtypeStruct((b_pad, 128), jnp.float32),
            ),
            grid_spec=pltpu.PrefetchScalarGridSpec(
                num_scalar_prefetch=0,
                grid=(n_tiles,),
                in_specs=[
                    pl.BlockSpec((tb, D), lambda bi: (bi, 0)),
                    pl.BlockSpec(tuple(w1.shape), lambda bi: (0,) * w1.ndim),
                    pl.BlockSpec(tuple(w2.shape), lambda bi: (0,) * w2.ndim),
                    pl.BlockSpec(tuple(b_all.shape), lambda bi: (0,) * b_all.ndim),
                ],
                out_specs=(
                    pl.BlockSpec((tb, D), lambda bi: (bi, 0)),
                    pl.BlockSpec((tb, 128), lambda bi: (bi, 0)),
                ),
            ),
            compiler_params=pltpu.CompilerParams(
                dimension_semantics=("parallel",),
                vmem_limit_bytes=vmem_limit,
            ),
            input_output_aliases={0: 0},   # state_in buffer reused for state_out
        )(state_in, w1, w2, b_all)

        # Re-interleave ONCE (static column scatter).
        out = jnp.zeros((B, D), jnp.float32)
        out = out.at[:, idx0].set(state_out[:B, :Dh])
        out = out.at[:, idx1].set(state_out[:B, Dh:])
        return out, lj[:B, 0]

    return jax.jit(forward)


# ----------------------------------------------------------------------------
# Pure-JAX reference of the PyTorch Realnvp.forward().
#   mxu_dtype=None       -> full-f32 reference (the module's semantics)
#   mxu_dtype=bfloat16   -> same bf16 MXU feeding as the kernel (tight check)
# ----------------------------------------------------------------------------
def realnvp_forward_ref(z, mask_list, layer_params, *, mxu_dtype=None):
    B, D = z.shape

    def dot(a, b):
        if mxu_dtype is None:
            return jnp.dot(a, b, precision=jax.lax.Precision.HIGHEST)
        return jnp.dot(a.astype(mxu_dtype), b.astype(mxu_dtype),
                       preferred_element_type=jnp.float32)

    def mlp(p, w1, b1, w2, b2):
        h = jnp.maximum(dot(p, w1) + b1, 0.0)
        return dot(h, w2) + b2

    lj = jnp.zeros((B,), jnp.float32)
    for i, lp in enumerate(layer_params):
        m = np.asarray(mask_list[i], dtype=bool)
        iy = np.nonzero(m)[0]
        ix = np.nonzero(~m)[0]
        y = z[:, iy]
        x = z[:, ix]
        if i % 2 == 0:
            s = mlp(y, lp["w1s"], lp["b1s"], lp["w2s"], lp["b2s"])
            t = mlp(y, lp["w1t"], lp["b1t"], lp["w2t"], lp["b2t"])
            x = jnp.exp(s) * x + t
        else:
            s = mlp(x, lp["w1s"], lp["b1s"], lp["w2s"], lp["b2s"])
            t = mlp(x, lp["w1t"], lp["b1t"], lp["w2t"], lp["b2t"])
            y = jnp.exp(s) * y + t
        lj = lj + jnp.sum(s, axis=1)
        z = jnp.zeros((B, D), z.dtype).at[:, iy].set(y).at[:, ix].set(x)
    return z, lj


# ----------------------------------------------------------------------------
# Deterministic parameter construction (synthetic; no checkpoint loading).
# Each s/t net is Linear(D/2 -> H) -> ReLU -> Linear(H -> D/2).
# ----------------------------------------------------------------------------
def make_params(key, n_layers, d_half, hidden):
    layers = []
    for _ in range(n_layers):
        key, *ks = jax.random.split(key, 9)
        scale = 0.1  # keep exp(s) well-behaved
        layers.append({
            "w1s": scale * jax.random.normal(ks[0], (d_half, hidden), jnp.float32),
            "b1s": scale * jax.random.normal(ks[1], (1, hidden), jnp.float32),
            "w2s": scale * jax.random.normal(ks[2], (hidden, d_half), jnp.float32),
            "b2s": scale * jax.random.normal(ks[3], (1, d_half), jnp.float32),
            "w1t": scale * jax.random.normal(ks[4], (d_half, hidden), jnp.float32),
            "b1t": scale * jax.random.normal(ks[5], (1, hidden), jnp.float32),
            "w2t": scale * jax.random.normal(ks[6], (hidden, d_half), jnp.float32),
            "b2t": scale * jax.random.normal(ks[7], (1, d_half), jnp.float32),
        })
    return layers


def _run_case(B, D, H, L, mask_np, key):
    kz, kp = jax.random.split(key)
    z = jax.random.normal(kz, (B, D), dtype=jnp.float32)
    params = make_params(kp, L, D // 2, H)

    fwd = build_realnvp_forward(mask_np, params)
    z_out, logjac = fwd(z)
    jax.block_until_ready((z_out, logjac))

    assert z_out.shape == (B, D) and logjac.shape == (B,)
    assert bool(jnp.all(jnp.isfinite(z_out))) and bool(jnp.all(jnp.isfinite(logjac)))

    # Tight check vs a reference that feeds the MXU bf16 exactly like the kernel.
    z_mx, lj_mx = realnvp_forward_ref(z, mask_np, params, mxu_dtype=jnp.bfloat16)
    np.testing.assert_allclose(np.asarray(z_out), np.asarray(z_mx), rtol=1e-3, atol=1e-3)
    np.testing.assert_allclose(np.asarray(logjac), np.asarray(lj_mx), rtol=1e-3, atol=1e-3)

    # Loose check vs the full-f32 reference of the PyTorch forward()
    # (difference is the intentional bf16 MXU feeding; log-jac stays f32).
    z_ref, lj_ref = realnvp_forward_ref(z, mask_np, params)
    np.testing.assert_allclose(np.asarray(z_out), np.asarray(z_ref), rtol=5e-2, atol=5e-2)
    np.testing.assert_allclose(np.asarray(logjac), np.asarray(lj_ref), rtol=5e-2, atol=5e-2)


if __name__ == "__main__":
    key = jax.random.PRNGKey(0)
    k1, k2 = jax.random.split(key)

    # Case 1: one checkerboard mask shared by all layers; small H,Dh -> the
    # fused block-diagonal w2 path (one MXU push for s and t).
    B1, D1, H1, L1 = 4, 16, 32, 4
    m1 = np.zeros((L1, D1), dtype=bool)
    m1[:, 0::2] = True
    _run_case(B1, D1, H1, L1, m1, k1)

    # Case 2: alternating masks, H above the w2-fusion threshold -> split-w2
    # path; batch exercises padding + multiple parallel batch tiles.
    B2, D2, H2, L2 = 20, 16, 96, 3
    base = np.zeros((D2,), dtype=bool)
    base[0::2] = True
    m2 = np.stack([base, ~base, base])
    _run_case(B2, D2, H2, L2, m2, k2)

    print("KERNEL_OK")
</pallas_src>

<mosaic_0001>
module attributes {stable_mosaic.version = 11 : i64} {
  func.func @kernel(%arg0: i32, %arg1: memref<8x16xf32, #tpu.memory_space<vmem>>, %arg2: memref<4x8x64xbf16, #tpu.memory_space<vmem>>, %arg3: memref<4x64x16xbf16, #tpu.memory_space<vmem>>, %arg4: memref<4x1x80xf32, #tpu.memory_space<vmem>>, %arg5: memref<8x16xf32, #tpu.memory_space<vmem>>, %arg6: memref<8x128xf32, #tpu.memory_space<vmem>>) attributes {dimension_semantics = [#tpu.dimension_semantics<parallel>], iteration_bounds = array<i64: 1>, scalar_prefetch = 0 : i64, scratch_operands = 0 : i64, tpu.core_type = #tpu.core_type<tc>, window_params = [{transform_indices = @transform_0, window_bounds = array<i64: 8, 16>}, {pipeline_mode = #tpu.pipeline_mode<synchronous>, transform_indices = @transform_1, window_bounds = array<i64: 4, 8, 64>}, {pipeline_mode = #tpu.pipeline_mode<synchronous>, transform_indices = @transform_2, window_bounds = array<i64: 4, 64, 16>}, {pipeline_mode = #tpu.pipeline_mode<synchronous>, transform_indices = @transform_3, window_bounds = array<i64: 4, 1, 80>}, {transform_indices = @transform_4, window_bounds = array<i64: 8, 16>}, {transform_indices = @transform_5, window_bounds = array<i64: 8, 128>}]} {
    %c0 = arith.constant 0 : index
    %c0_0 = arith.constant 0 : index
    %0 = vector.load %arg1[%c0, %c0_0] : memref<8x16xf32, #tpu.memory_space<vmem>>, vector<8x16xf32>
    %1 = vector.extract_strided_slice %0 {offsets = [0, 0], sizes = [8, 8], strides = [1, 1]} : vector<8x16xf32> to vector<8x8xf32>
    %2 = vector.extract_strided_slice %0 {offsets = [0, 8], sizes = [8, 8], strides = [1, 1]} : vector<8x16xf32> to vector<8x8xf32>
    %cst = arith.constant 0.000000e+00 : f32
    %3 = vector.broadcast %cst : f32 to vector<8x8xf32>
    %c0_1 = arith.constant 0 : index
    %c0_2 = arith.constant 0 : index
    %c0_3 = arith.constant 0 : index
    %4 = vector.load %arg2[%c0_1, %c0_2, %c0_3] : memref<4x8x64xbf16, #tpu.memory_space<vmem>>, vector<1x8x64xbf16>
    %5 = vector.shape_cast %4 : vector<1x8x64xbf16> to vector<8x64xbf16>
    %c0_4 = arith.constant 0 : index
    %c0_5 = arith.constant 0 : index
    %c0_6 = arith.constant 0 : index
    %6 = vector.load %arg4[%c0_4, %c0_5, %c0_6] : memref<4x1x80xf32, #tpu.memory_space<vmem>>, vector<1x1x80xf32>
    %7 = vector.shape_cast %6 : vector<1x1x80xf32> to vector<1x80xf32>
    %8 = vector.extract_strided_slice %7 {offsets = [0, 0], sizes = [1, 64], strides = [1, 1]} : vector<1x80xf32> to vector<1x64xf32>
    %9 = vector.extract_strided_slice %7 {offsets = [0, 64], sizes = [1, 8], strides = [1, 1]} : vector<1x80xf32> to vector<1x8xf32>
    %10 = vector.extract_strided_slice %7 {offsets = [0, 72], sizes = [1, 8], strides = [1, 1]} : vector<1x80xf32> to vector<1x8xf32>
    %11 = arith.truncf %2 : vector<8x8xf32> to vector<8x8xbf16>
    %cst_7 = arith.constant dense<0.000000e+00> : vector<8x64xf32>
    %12 = tpu.matmul %11, %5, %cst_7 {dimension_numbers = #tpu.dot_dimension_numbers<[1], [0], [0], [1], [0, 0, 1, 1], [], []>} : vector<8x8xbf16>, vector<8x64xbf16>, vector<8x64xf32> -> vector<8x64xf32>
    %13 = vector.broadcast %8 : vector<1x64xf32> to vector<8x64xf32>
    %14 = arith.addf %12, %13 : vector<8x64xf32>
    %cst_8 = arith.constant 0.000000e+00 : f32
    %15 = vector.broadcast %cst_8 : f32 to vector<8x64xf32>
    %16 = arith.maximumf %14, %15 : vector<8x64xf32>
    %17 = arith.truncf %16 : vector<8x64xf32> to vector<8x64xbf16>
    %c0_9 = arith.constant 0 : index
    %c0_10 = arith.constant 0 : index
    %c0_11 = arith.constant 0 : index
    %18 = vector.load %arg3[%c0_9, %c0_10, %c0_11] : memref<4x64x16xbf16, #tpu.memory_space<vmem>>, vector<1x64x16xbf16>
    %19 = vector.shape_cast %18 : vector<1x64x16xbf16> to vector<64x16xbf16>
    %cst_12 = arith.constant dense<0.000000e+00> : vector<8x16xf32>
    %20 = tpu.matmul %17, %19, %cst_12 {dimension_numbers = #tpu.dot_dimension_numbers<[1], [0], [0], [1], [0, 0, 1, 1], [], []>} : vector<8x64xbf16>, vector<64x16xbf16>, vector<8x16xf32> -> vector<8x16xf32>
    %21 = vector.extract_strided_slice %20 {offsets = [0, 0], sizes = [8, 8], strides = [1, 1]} : vector<8x16xf32> to vector<8x8xf32>
    %22 = vector.broadcast %9 : vector<1x8xf32> to vector<8x8xf32>
    %23 = arith.addf %21, %22 : vector<8x8xf32>
    %24 = vector.extract_strided_slice %20 {offsets = [0, 8], sizes = [8, 8], strides = [1, 1]} : vector<8x16xf32> to vector<8x8xf32>
    %25 = vector.broadcast %10 : vector<1x8xf32> to vector<8x8xf32>
    %26 = arith.addf %24, %25 : vector<8x8xf32>
    %27 = math.exp %23 : vector<8x8xf32>
    %28 = arith.mulf %27, %1 : vector<8x8xf32>
    %29 = arith.addf %28, %26 : vector<8x8xf32>
    %30 = arith.addf %3, %23 : vector<8x8xf32>
    %c1 = arith.constant 1 : index
    %c0_13 = arith.constant 0 : index
    %c0_14 = arith.constant 0 : index
    %31 = vector.load %arg2[%c1, %c0_13, %c0_14] : memref<4x8x64xbf16, #tpu.memory_space<vmem>>, vector<1x8x64xbf16>
    %32 = vector.shape_cast %31 : vector<1x8x64xbf16> to vector<8x64xbf16>
    %c1_15 = arith.constant 1 : index
    %c0_16 = arith.constant 0 : index
    %c0_17 = arith.constant 0 : index
    %33 = vector.load %arg4[%c1_15, %c0_16, %c0_17] : memref<4x1x80xf32, #tpu.memory_space<vmem>>, vector<1x1x80xf32>
    %34 = vector.shape_cast %33 : vector<1x1x80xf32> to vector<1x80xf32>
    %35 = vector.extract_strided_slice %34 {offsets = [0, 0], sizes = [1, 64], strides = [1, 1]} : vector<1x80xf32> to vector<1x64xf32>
    %36 = vector.extract_strided_slice %34 {offsets = [0, 64], sizes = [1, 8], strides = [1, 1]} : vector<1x80xf32> to vector<1x8xf32>
    %37 = vector.extract_strided_slice %34 {offsets = [0, 72], sizes = [1, 8], strides = [1, 1]} : vector<1x80xf32> to vector<1x8xf32>
    %38 = arith.truncf %29 : vector<8x8xf32> to vector<8x8xbf16>
    %cst_18 = arith.constant dense<0.000000e+00> : vector<8x64xf32>
    %39 = tpu.matmul %38, %32, %cst_18 {dimension_numbers = #tpu.dot_dimension_numbers<[1], [0], [0], [1], [0, 0, 1, 1], [], []>} : vector<8x8xbf16>, vector<8x64xbf16>, vector<8x64xf32> -> vector<8x64xf32>
    %40 = vector.broadcast %35 : vector<1x64xf32> to vector<8x64xf32>
    %41 = arith.addf %39, %40 : vector<8x64xf32>
    %cst_19 = arith.constant 0.000000e+00 : f32
    %42 = vector.broadcast %cst_19 : f32 to vector<8x64xf32>
    %43 = arith.maximumf %41, %42 : vector<8x64xf32>
    %44 = arith.truncf %43 : vector<8x64xf32> to vector<8x64xbf16>
    %c1_20 = arith.constant 1 : index
    %c0_21 = arith.constant 0 : index
    %c0_22 = arith.constant 0 : index
    %45 = vector.load %arg3[%c1_20, %c0_21, %c0_22] : memref<4x64x16xbf16, #tpu.memory_space<vmem>>, vector<1x64x16xbf16>
    %46 = vector.shape_cast %45 : vector<1x64x16xbf16> to vector<64x16xbf16>
    %cst_23 = arith.constant dense<0.000000e+00> : vector<8x16xf32>
    %47 = tpu.matmul %44, %46, %cst_23 {dimension_numbers = #tpu.dot_dimension_numbers<[1], [0], [0], [1], [0, 0, 1, 1], [], []>} : vector<8x64xbf16>, vector<64x16xbf16>, vector<8x16xf32> -> vector<8x16xf32>
    %48 = vector.extract_strided_slice %47 {offsets = [0, 0], sizes = [8, 8], strides = [1, 1]} : vector<8x16xf32> to vector<8x8xf32>
    %49 = vector.broadcast %36 : vector<1x8xf32> to vector<8x8xf32>
    %50 = arith.addf %48, %49 : vector<8x8xf32>
    %51 = vector.extract_strided_slice %47 {offsets = [0, 8], sizes = [8, 8], strides = [1, 1]} : vector<8x16xf32> to vector<8x8xf32>
    %52 = vector.broadcast %37 : vector<1x8xf32> to vector<8x8xf32>
    %53 = arith.addf %51, %52 : vector<8x8xf32>
    %54 = math.exp %50 : vector<8x8xf32>
    %55 = arith.mulf %54, %2 : vector<8x8xf32>
    %56 = arith.addf %55, %53 : vector<8x8xf32>
    %57 = arith.addf %30, %50 : vector<8x8xf32>
    %c2 = arith.constant 2 : index
    %c0_24 = arith.constant 0 : index
    %c0_25 = arith.constant 0 : index
    %58 = vector.load %arg2[%c2, %c0_24, %c0_25] : memref<4x8x64xbf16, #tpu.memory_space<vmem>>, vector<1x8x64xbf16>
    %59 = vector.shape_cast %58 : vector<1x8x64xbf16> to vector<8x64xbf16>
    %c2_26 = arith.constant 2 : index
    %c0_27 = arith.constant 0 : index
    %c0_28 = arith.constant 0 : index
    %60 = vector.load %arg4[%c2_26, %c0_27, %c0_28] : memref<4x1x80xf32, #tpu.memory_space<vmem>>, vector<1x1x80xf32>
    %61 = vector.shape_cast %60 : vector<1x1x80xf32> to vector<1x80xf32>
    %62 = vector.extract_strided_slice %61 {offsets = [0, 0], sizes = [1, 64], strides = [1, 1]} : vector<1x80xf32> to vector<1x64xf32>
    %63 = vector.extract_strided_slice %61 {offsets = [0, 64], sizes = [1, 8], strides = [1, 1]} : vector<1x80xf32> to vector<1x8xf32>
    %64 = vector.extract_strided_slice %61 {offsets = [0, 72], sizes = [1, 8], strides = [1, 1]} : vector<1x80xf32> to vector<1x8xf32>
    %65 = arith.truncf %56 : vector<8x8xf32> to vector<8x8xbf16>
    %cst_29 = arith.constant dense<0.000000e+00> : vector<8x64xf32>
    %66 = tpu.matmul %65, %59, %cst_29 {dimension_numbers = #tpu.dot_dimension_numbers<[1], [0], [0], [1], [0, 0, 1, 1], [], []>} : vector<8x8xbf16>, vector<8x64xbf16>, vector<8x64xf32> -> vector<8x64xf32>
    %67 = vector.broadcast %62 : vector<1x64xf32> to vector<8x64xf32>
    %68 = arith.addf %66, %67 : vector<8x64xf32>
    %cst_30 = arith.constant 0.000000e+00 : f32
    %69 = vector.broadcast %cst_30 : f32 to vector<8x64xf32>
    %70 = arith.maximumf %68, %69 : vector<8x64xf32>
    %71 = arith.truncf %70 : vector<8x64xf32> to vector<8x64xbf16>
    %c2_31 = arith.constant 2 : index
    %c0_32 = arith.constant 0 : index
    %c0_33 = arith.constant 0 : index
    %72 = vector.load %arg3[%c2_31, %c0_32, %c0_33] : memref<4x64x16xbf16, #tpu.memory_space<vmem>>, vector<1x64x16xbf16>
    %73 = vector.shape_cast %72 : vector<1x64x16xbf16> to vector<64x16xbf16>
    %cst_34 = arith.constant dense<0.000000e+00> : vector<8x16xf32>
    %74 = tpu.matmul %71, %73, %cst_34 {dimension_numbers = #tpu.dot_dimension_numbers<[1], [0], [0], [1], [0, 0, 1, 1], [], []>} : vector<8x64xbf16>, vector<64x16xbf16>, vector<8x16xf32> -> vector<8x16xf32>
    %75 = vector.extract_strided_slice %74 {offsets = [0, 0], sizes = [8, 8], strides = [1, 1]} : vector<8x16xf32> to vector<8x8xf32>
    %76 = vector.broadcast %63 : vector<1x8xf32> to vector<8x8xf32>
    %77 = arith.addf %75, %76 : vector<8x8xf32>
    %78 = vector.extract_strided_slice %74 {offsets = [0, 8], sizes = [8, 8], strides = [1, 1]} : vector<8x16xf32> to vector<8x8xf32>
    %79 = vector.broadcast %64 : vector<1x8xf32> to vector<8x8xf32>
    %80 = arith.addf %78, %79 : vector<8x8xf32>
    %81 = math.exp %77 : vector<8x8xf32>
    %82 = arith.mulf %81, %29 : vector<8x8xf32>
    %83 = arith.addf %82, %80 : vector<8x8xf32>
    %84 = arith.addf %57, %77 : vector<8x8xf32>
    %c3 = arith.constant 3 : index
    %c0_35 = arith.constant 0 : index
    %c0_36 = arith.constant 0 : index
    %85 = vector.load %arg2[%c3, %c0_35, %c0_36] : memref<4x8x64xbf16, #tpu.memory_space<vmem>>, vector<1x8x64xbf16>
    %86 = vector.shape_cast %85 : vector<1x8x64xbf16> to vector<8x64xbf16>
    %c3_37 = arith.constant 3 : index
    %c0_38 = arith.constant 0 : index
    %c0_39 = arith.constant 0 : index
    %87 = vector.load %arg4[%c3_37, %c0_38, %c0_39] : memref<4x1x80xf32, #tpu.memory_space<vmem>>, vector<1x1x80xf32>
    %88 = vector.shape_cast %87 : vector<1x1x80xf32> to vector<1x80xf32>
    %89 = vector.extract_strided_slice %88 {offsets = [0, 0], sizes = [1, 64], strides = [1, 1]} : vector<1x80xf32> to vector<1x64xf32>
    %90 = vector.extract_strided_slice %88 {offsets = [0, 64], sizes = [1, 8], strides = [1, 1]} : vector<1x80xf32> to vector<1x8xf32>
    %91 = vector.extract_strided_slice %88 {offsets = [0, 72], sizes = [1, 8], strides = [1, 1]} : vector<1x80xf32> to vector<1x8xf32>
    %92 = arith.truncf %83 : vector<8x8xf32> to vector<8x8xbf16>
    %cst_40 = arith.constant dense<0.000000e+00> : vector<8x64xf32>
    %93 = tpu.matmul %92, %86, %cst_40 {dimension_numbers = #tpu.dot_dimension_numbers<[1], [0], [0], [1], [0, 0, 1, 1], [], []>} : vector<8x8xbf16>, vector<8x64xbf16>, vector<8x64xf32> -> vector<8x64xf32>
    %94 = vector.broadcast %89 : vector<1x64xf32> to vector<8x64xf32>
    %95 = arith.addf %93, %94 : vector<8x64xf32>
    %cst_41 = arith.constant 0.000000e+00 : f32
    %96 = vector.broadcast %cst_41 : f32 to vector<8x64xf32>
    %97 = arith.maximumf %95, %96 : vector<8x64xf32>
    %98 = arith.truncf %97 : vector<8x64xf32> to vector<8x64xbf16>
    %c3_42 = arith.constant 3 : index
    %c0_43 = arith.constant 0 : index
    %c0_44 = arith.constant 0 : index
    %99 = vector.load %arg3[%c3_42, %c0_43, %c0_44] : memref<4x64x16xbf16, #tpu.memory_space<vmem>>, vector<1x64x16xbf16>
    %100 = vector.shape_cast %99 : vector<1x64x16xbf16> to vector<64x16xbf16>
    %cst_45 = arith.constant dense<0.000000e+00> : vector<8x16xf32>
    %101 = tpu.matmul %98, %100, %cst_45 {dimension_numbers = #tpu.dot_dimension_numbers<[1], [0], [0], [1], [0, 0, 1, 1], [], []>} : vector<8x64xbf16>, vector<64x16xbf16>, vector<8x16xf32> -> vector<8x16xf32>
    %102 = vector.extract_strided_slice %101 {offsets = [0, 0], sizes = [8, 8], strides = [1, 1]} : vector<8x16xf32> to vector<8x8xf32>
    %103 = vector.broadcast %90 : vector<1x8xf32> to vector<8x8xf32>
    %104 = arith.addf %102, %103 : vector<8x8xf32>
    %105 = vector.extract_strided_slice %101 {offsets = [0, 8], sizes = [8, 8], strides = [1, 1]} : vector<8x16xf32> to vector<8x8xf32>
    %106 = vector.broadcast %91 : vector<1x8xf32> to vector<8x8xf32>
    %107 = arith.addf %105, %106 : vector<8x8xf32>
    %108 = math.exp %104 : vector<8x8xf32>
    %109 = arith.mulf %108, %56 : vector<8x8xf32>
    %110 = arith.addf %109, %107 : vector<8x8xf32>
    %111 = arith.addf %84, %104 : vector<8x8xf32>
    %c0_46 = arith.constant 0 : index
    %c0_47 = arith.constant 0 : index
    %112 = vector.load %arg5[%c0_46, %c0_47] : memref<8x16xf32, #tpu.memory_space<vmem>>, vector<8x8xf32>
    tpu.vector_store %arg5[%c0_46, %c0_47], %83 {strides = array<i32>} : memref<8x16xf32, #tpu.memory_space<vmem>>, vector<8x8xf32>,
    %c0_48 = arith.constant 0 : index
    %c8 = arith.constant 8 : index
    %113 = vector.load %arg5[%c0_48, %c8] : memref<8x16xf32, #tpu.memory_space<vmem>>, vector<8x8xf32>
    tpu.vector_store %arg5[%c0_48, %c8], %110 {strides = array<i32>} : memref<8x16xf32, #tpu.memory_space<vmem>>, vector<8x8xf32>,
    %cst_49 = arith.constant 0.000000e+00 : f32
    %114 = vector.broadcast %cst_49 : f32 to vector<8x128xf32>
    %cst_50 = arith.constant dense<0.000000e+00> : vector<8xf32>
    %115 = vector.multi_reduction <add>, %111, %cst_50 [1] : vector<8x8xf32> to vector<8xf32>
    %116 = vector.shape_cast %115 : vector<8xf32> to vector<8x1xf32>
    %117 = vector.broadcast %116 : vector<8x1xf32> to vector<8x128xf32>
    %118 = arith.addf %114, %117 : vector<8x128xf32>
    %c0_51 = arith.constant 0 : index
    %c0_52 = arith.constant 0 : index
    %119 = vector.load %arg6[%c0_51, %c0_52] : memref<8x128xf32, #tpu.memory_space<vmem>>, vector<8x128xf32>
    tpu.vector_store %arg6[%c0_51, %c0_52], %118 {strides = array<i32>} : memref<8x128xf32, #tpu.memory_space<vmem>>, vector<8x128xf32>,
    return
  }
  func.func @transform_0(%arg0: i32) -> (i32, i32) {
    %c0_i32 = arith.constant 0 : i32
    %c0_i32_0 = arith.constant 0 : i32
    return %arg0, %c0_i32 : i32, i32
  }
  func.func @transform_1(%arg0: i32) -> (i32, i32, i32) {
    %c0_i32 = arith.constant 0 : i32
    %c0_i32_0 = arith.constant 0 : i32
    %c0_i32_1 = arith.constant 0 : i32
    %c0_i32_2 = arith.constant 0 : i32
    return %c0_i32, %c0_i32_0, %c0_i32_1 : i32, i32, i32
  }
  func.func @transform_2(%arg0: i32) -> (i32, i32, i32) {
    %c0_i32 = arith.constant 0 : i32
    %c0_i32_0 = arith.constant 0 : i32
    %c0_i32_1 = arith.constant 0 : i32
    %c0_i32_2 = arith.constant 0 : i32
    return %c0_i32, %c0_i32_0, %c0_i32_1 : i32, i32, i32
  }
  func.func @transform_3(%arg0: i32) -> (i32, i32, i32) {
    %c0_i32 = arith.constant 0 : i32
    %c0_i32_0 = arith.constant 0 : i32
    %c0_i32_1 = arith.constant 0 : i32
    %c0_i32_2 = arith.constant 0 : i32
    return %c0_i32, %c0_i32_0, %c0_i32_1 : i32, i32, i32
  }
  func.func @transform_4(%arg0: i32) -> (i32, i32) {
    %c0_i32 = arith.constant 0 : i32
    %c0_i32_0 = arith.constant 0 : i32
    return %arg0, %c0_i32 : i32, i32
  }
  func.func @transform_5(%arg0: i32) -> (i32, i32) {
    %c0_i32 = arith.constant 0 : i32
    %c0_i32_0 = arith.constant 0 : i32
    return %arg0, %c0_i32 : i32, i32
  }
}

</mosaic_0001>

<bundles_post_ra>
// kernel: forward.1
= control target key start
LH: loop header
LB: loop body
LE: loop exit
PB: predicated region body
PF: predicated region fallthrough
CT: control target
= control target key end

     0   :  { %11 = vsyncpa [#allocation3], 0  ;;  %s587_s21 = smov [#allocation2]   ;;  %s588_s23 = smov 64   ;;  %s733_s0 = inlined_call_operand.vmem [shape: f32[8,16], index: 0, kind: input, shape index: {}, may-alias: {0,4}]   ;;  %s734_s1 = inlined_call_operand.hbm [shape: bf16[4,8,64], index: 1, kind: input, shape index: {}]   ;;  %s735_s2 = inlined_call_operand.vmem [shape: bf16[4,64,16], index: 2, kind: input, shape index: {}]   ;;  %s736_s3 = inlined_call_operand.vmem [shape: f32[4,1,80], index: 3, kind: input, shape index: {}]   ;;  %s737_s4 = inlined_call_operand.vmem [shape: f32[8,16], index: 4, kind: output, shape index: {0}, may-alias: {0,4}]   ;;  %s738_s5 = inlined_call_operand.vmem [shape: f32[8,128], index: 5, kind: output, shape index: {1}]  }
   0x1   :  { %s18_s20 = sshll.u32 %s734_s1, 4  ;;  %s20_s22 = sshll.u32 %s587_s21, 4  ;;  %s19_s20 = int_to_ptr.hbm [resolvable:$true] %s18_s20  ;;  %s21_s22 = int_to_ptr.vmem [resolvable:$true] %s20_s22 }
   0x2   :  { %s589_s24 = smov 4  }
   0x3   :  { %26 = dma.hbm_to_vmem [thread:$0]  %s19_s20, 256, %s21_s22, [#allocation3], %s588_s23, %s588_s23, %s589_s24  }
   0x4   :  { %585 = dma.done.wait [#allocation3], 256  }
   0x5   :  { %586 = vsyncadd [#allocation3], 4294967040  ;;  %vm50_vm0 = vcmask 1043456   ;;  %v36_v0 = vld [vmem:[%s733_s0] sm:$0xff]  ;;  %s590_s1 = smov 120   ;;  %v531_v4 = vld [vmem:[%s735_s2 + $0x18] sm:$0xff] }
   0x6   :  { %v37_v1 = vld [vmem:[#allocation2] sm:$0xf]  ;;  %v39_v2 = vpack.c.bf16 %v36_v0, %v36_v0  ;;  %216 = vrot.lane.b32.xlu2 %v36_v0, %s590_s1  ;;  %109 = vmatpush.bf16.msra.mxu1 %v531_v4  ;;  %v530_v6 = vld [vmem:[%s735_s2 + $0x10] sm:$0xff]  ;;  %vm46_vm1 = vcmask 64512   ;;  %v529_v8 = vld [vmem:[%s735_s2 + $0x8] sm:$0xff]  ;;  %vm101_vm2 = vcmask 523264  }
   0x7   :  { %v52_v3 = vsel %vm50_vm0, %v37_v1, 0  ;;  %v549_v5 = vld [vmem:[%s736_s3] ss:$0 sm:$0xff]  ;;  %v132_v19 = vld [vmem:[#allocation2 + $0x4] sm:$0xf]  ;;  %v535_v21 = vld [vmem:[%s735_s2 + $0x38] sm:$0xff] }
   0x8   :  { %61 = vmatpush.bf16.msra.mxu0 %v52_v3  ;;  %44 = vrot.lane.b32.xlu0 %v39_v2, %s590_s1  ;;  %v528_v9 = vld [vmem:[%s735_s2] sm:$0xff]  ;;  %v143_v20 = vsel %vm50_vm0, %v132_v19, 0  ;;  %v534_v23 = vld [vmem:[%s735_s2 + $0x30] sm:$0xff]  ;;  %v533_v30 = vld [vmem:[%s735_s2 + $0x28] sm:$0xff]  ;;  %vm413_vm3 = vcmask 130112  }
   0x9   :  { %152 = vmatpush.bf16.msra.mxu2 %v143_v20  ;;  %v550_v22 = vld [vmem:[%s736_s3 + $0x1] ss:$0 sm:$0xff]  ;;  %200 = vmatpush.bf16.msra.mxu3 %v535_v21  ;;  %v227_v37 = vld [vmem:[#allocation2 + $0x8] sm:$0xf]  ;;  %v539_v43 = vld [vmem:[%s735_s2 + $0x58] sm:$0xff] }
   0xa   :  { %110 = vmatpush.bf16.msra.mxu1 %v530_v6  ;;  %v532_v31 = vld [vmem:[%s735_s2 + $0x20] sm:$0xff]  ;;  %v238_v38 = vsel %vm50_vm0, %v227_v37, 0  ;;  %v538_v45 = vld [vmem:[%s735_s2 + $0x50] sm:$0xff]  ;;  %v537_v46 = vld [vmem:[%s735_s2 + $0x48] sm:$0xff] }
   0xb   :  { %v551_v44 = vld [vmem:[%s736_s3 + $0x2] ss:$0 sm:$0xff]  ;;  %v318_v60 = vld [vmem:[#allocation2 + $0xc] sm:$0xf]  ;;  %v543_v4 = vld [vmem:[%s735_s2 + $0x78] sm:$0xff] }
   0xc   :  { %247 = vmatpush.bf16.msrb.mxu0 %v238_v38  ;;  %v536_v54 = vld [vmem:[%s735_s2 + $0x40] sm:$0xff]  ;;  %v329_v61 = vsel %vm50_vm0, %v318_v60, 0  ;;  %v542_v6 = vld [vmem:[%s735_s2 + $0x70] sm:$0xff] }
   0xd   :  { %201 = vmatpush.bf16.msra.mxu3 %v534_v23  ;;  %295 = vmatpush.bf16.msrb.mxu2 %v539_v43 }
   0xe   :  { %111 = vmatpush.bf16.msra.mxu1 %v529_v8 }
  0x10   :  { %118 = vrot.lane.b32.xlu0 %v549_v5, %s588_s23 }
  0x11   :  { %202 = vmatpush.bf16.msra.mxu3 %v533_v30  ;;  %296 = vmatpush.bf16.msrb.mxu2 %v538_v45 }
  0x12   :  { %112 = vmatpush.bf16.msra.mxu1 %v528_v9 }
  0x15   :  { %203 = vmatpush.bf16.msra.mxu3 %v532_v31  ;;  %297 = vmatpush.bf16.msrb.mxu2 %v537_v46 }
  0x16   :  { %338 = vmatpush.bf16.msrb.mxu1 %v329_v61 }
  0x18   :  { %304 = vrot.lane.b32.xlu0 %v551_v44, %s588_s23 }
  0x19   :  { %298 = vmatpush.bf16.msrb.mxu2 %v536_v54  ;;  %386 = vmatpush.bf16.msrb.mxu3 %v543_v4 }
  0x1d   :  { %387 = vmatpush.bf16.msrb.mxu3 %v542_v6 }
  0x60   :  { %v217_v48 = vpop.permute.xlu2 %216 }
  0x7a   :  { %v45_v7 = vpop.permute.xlu0 %44 }
  0x7b   :  { %429 = vmatmul.msk.bf16.vlgmr.msra.gmra.mxu0 %vm46_vm1, %v45_v7  ;;  %v541_v7 = vld [vmem:[%s735_s2 + $0x68] sm:$0xff] }
  0x7c   :  { %388 = vmatpush.bf16.msrb.mxu3 %v541_v7 }
  0x82   :  { %v119_v15 = vpop.permute.xlu0 %118 }
  0x8a   :  { %v305_v62 = vpop.permute.xlu0 %304 }
  0xf8   :  { %v63_v10 = vpop.f32.mrf.mxu0 }
  0xf9   :  { %v64_v11 = vadd.f32 %v549_v5, %v63_v10  ;;  %v552_v5 = vld [vmem:[%s736_s3 + $0x3] ss:$0 sm:$0xff] }
  0xfb   :  { %v67_v12 = vmax.f32 %v64_v11, 0.0 }
  0xfd   :  { %v68_v13 = vpack.c.bf16 %v67_v12, %v67_v12 }
  0xff   :  { %446 = vmatmul.msk.bf16.vlgmr.msra.gmra.mxu1 %vm101_vm2, %v68_v13 }
 0x100   :  { %v65_v14 = vpop.f32.mrf.mxu0 }
 0x101   :  { %v540_v14 = vld [vmem:[%s735_s2 + $0x60] sm:$0xff]  ;;  %s591_s2 = smov 8  }
 0x102   :  { %389 = vmatpush.bf16.msrb.mxu3 %v540_v14 }
 0x17c   :  { %v114_v16 = vpop.f32.mrf.mxu1 }
 0x17d   :  { %v651_v17 = vadd.f32 %v119_v15, %v114_v16 }
 0x17f   :  { %126 = vrot.lane.b32.xlu1 %v651_v17, %s590_s1  ;;  %v122_v24 = vmul.f32 1.442695, %v651_v17 }
 0x181   :  { %553 = vpow2.f32 %v122_v24 }
 0x184   :  { %v116_v18 = vpop.f32.mrf.mxu1 }
 0x187   :  { %209 = vrot.lane.b32.xlu1 %v550_v22, %s588_s23  ;;  %v554_v25 = vpop.eup %553 }
 0x188   :  { %v124_v26 = vmul.f32 %v554_v25, %v36_v0 }
 0x1f1   :  { %v127_v27 = vpop.permute.xlu1 %126 }
 0x1f2   :  { %v667_v28 = vadd.f32 %v127_v27, %v124_v26 }
 0x1f4   :  { %v135_v29 = vpack.c.bf16 %v667_v28, %v667_v28 }
 0x1f6   :  { %448 = vmatmul.msk.bf16.vlgmr.msra.gmra.mxu2 %vm46_vm1, %v135_v29 }
 0x1f9   :  { %v210_v39 = vpop.permute.xlu1 %209 }
 0x279   :  { %v154_v32 = vpop.f32.mrf.mxu2 }
 0x27a   :  { %v155_v33 = vadd.f32 %v550_v22, %v154_v32 }
 0x27c   :  { %v158_v34 = vmax.f32 %v155_v33, 0.0 }
 0x27e   :  { %v159_v35 = vpack.c.bf16 %v158_v34, %v158_v34 }
 0x280   :  { %473 = vmatmul.msk.bf16.vlgmr.msra.gmra.mxu3 %vm101_vm2, %v159_v35 }
 0x281   :  { %v156_v36 = vpop.f32.mrf.mxu2 }
 0x303   :  { %v205_v40 = vpop.f32.mrf.mxu3 }
 0x304   :  { %v212_v41 = vadd.f32 %v210_v39, %v205_v40 }
 0x306   :  { %221 = vrot.lane.b32.xlu2 %v212_v41, %s590_s1  ;;  %v213_v47 = vmul.f32 1.442695, %v212_v41  ;;  %v225_v0 = vadd.f32 %v212_v41, %v651_v17 }
 0x308   :  { %555 = vpow2.f32 %v213_v47 }
 0x30b   :  { %v207_v42 = vpop.f32.mrf.mxu3 }
 0x30e   :  { %v556_v49 = vpop.eup %555  ;;  %395 = vrot.lane.b32.xlu2 %v552_v5, %s588_s23 }
 0x30f   :  { %v219_v50 = vmul.f32 %v556_v49, %v217_v48 }
 0x360   :  { %v222_v51 = vpop.permute.xlu2 %221 }
 0x361   :  { %v224_v52 = vadd.f32 %v222_v51, %v219_v50 }
 0x363   :  { %v230_v53 = vpack.c.bf16 %v224_v52, %v224_v52 }
 0x365   :  { %475 = vmatmul.msk.bf16.vlgmr.msrb.gmra.mxu0 %vm46_vm1, %v230_v53 }
 0x368   :  { %v396_v20 = vpop.permute.xlu2 %395 }
 0x3e2   :  { %v249_v55 = vpop.f32.mrf.mxu0 }
 0x3e3   :  { %v250_v56 = vadd.f32 %v551_v44, %v249_v55 }
 0x3e5   :  { %v253_v57 = vmax.f32 %v250_v56, 0.0 }
 0x3e7   :  { %v254_v58 = vpack.c.bf16 %v253_v57, %v253_v57 }
 0x3e9   :  { %500 = vmatmul.msk.bf16.vlgmr.msrb.gmra.mxu2 %vm101_vm2, %v254_v58 }
 0x3ea   :  { %v251_v59 = vpop.f32.mrf.mxu0 }
 0x46c   :  { %v300_v63 = vpop.f32.mrf.mxu2 }
 0x46d   :  { %v307_v1 = vadd.f32 %v305_v62, %v300_v63 }
 0x46f   :  { %312 = vrot.lane.b32.xlu1 %v307_v1, %s590_s1  ;;  %v316_v2 = vadd.f32 %v307_v1, %v225_v0  ;;  %v308_v8 = vmul.f32 1.442695, %v307_v1 }
 0x471   :  { %557 = vpow2.f32 %v308_v8 }
 0x474   :  { %v302_v3 = vpop.f32.mrf.mxu2 }
 0x477   :  { %v558_v9 = vpop.eup %557 }
 0x478   :  { %v310_v10 = vmul.f32 %v558_v9, %v667_v28 }
 0x4e1   :  { %v313_v11 = vpop.permute.xlu1 %312 }
 0x4e2   :  { %v315_v12 = vadd.f32 %v313_v11, %v310_v10 }
 0x4e4   :  { %v321_v13 = vpack.c.bf16 %v315_v12, %v315_v12  ;;  %408 = vst.msk [vmem:[%s737_s4] sm:$0xff] %vm46_vm1, %v315_v12 }
 0x4e6   :  { %502 = vmatmul.msk.bf16.vlgmr.msrb.gmra.mxu1 %vm46_vm1, %v321_v13 }
 0x563   :  { %v340_v15 = vpop.f32.mrf.mxu1 }
 0x564   :  { %v341_v16 = vadd.f32 %v552_v5, %v340_v15 }
 0x566   :  { %v344_v17 = vmax.f32 %v341_v16, 0.0 }
 0x568   :  { %v345_v18 = vpack.c.bf16 %v344_v17, %v344_v17 }
 0x56a   :  { %527 = vmatmul.msk.bf16.vlgmr.msrb.gmra.mxu3 %vm101_vm2, %v345_v18 }
 0x56b   :  { %v342_v19 = vpop.f32.mrf.mxu1 }
 0x5ed   :  { %v391_v21 = vpop.f32.mrf.mxu3 }
 0x5ee   :  { %v398_v22 = vadd.f32 %v396_v20, %v391_v21 }
 0x5f0   :  { %403 = vrot.lane.b32.xlu0 %v398_v22, %s590_s1  ;;  %v407_v23 = vadd.f32 %v398_v22, %v316_v2  ;;  %v399_v26 = vmul.f32 1.442695, %v398_v22 }
 0x5f2   :  { %v415_v24 = vsel %vm46_vm1, %v407_v23, 0.0  ;;  %559 = vpow2.f32 %v399_v26 }
 0x5f3   :  { %416 = vadd.xlane.f32.xlu1 %v415_v24 }
 0x5f5   :  { %v393_v25 = vpop.f32.mrf.mxu3 }
 0x5f8   :  { %v560_v27 = vpop.eup %559 }
 0x5f9   :  { %v401_v28 = vmul.f32 %v560_v27, %v224_v52 }
 0x662   :  { %v404_v29 = vpop.permute.xlu0 %403 }
 0x663   :  { %v406_v30 = vadd.f32 %v404_v29, %v401_v28 }
 0x665   :  { %410 = vrot.lane.b32.xlu2 %v406_v30, %s591_s2 }
 0x666   :  { %v417_v31 = vpop.xlane.xlu1 %416 }
 0x667   :  { %419 = vst [vmem:[%s738_s5] sm:$0xff] %v417_v31 }
 0x6bf   :  { %v411_v32 = vpop.permute.xlu2 %410 }
 0x6c0   :  { %414 = vst.msk [vmem:[%s737_s4] sm:$0xff] %vm413_vm3, %v411_v32 }
 0x6c1   :  { %428 = vsyncpa [#allocation3], 1 }

</bundles_post_ra>
